<compile_context>
chip_gen: v5e
topology: v5e:2x2
jax: 0.10.0
libtpu: 0.0.40
codegen_flags: <defaults>
</compile_context>

<pallas_src>
import functools
import math

import jax
import jax.numpy as jnp
from jax.experimental import pallas as pl
from jax.experimental.pallas import tpu as pltpu

_LANE = 128


def channel_encoder_kernel(x_ref, w1_ref, b1_ref, w2_ref, b2_ref, o_ref, *, scale):
    # linear1: bf16 MXU inputs (x cast in-register), f32 accumulation; bias add + ReLU in f32.
    h = jnp.dot(x_ref[...].astype(jnp.bfloat16), w1_ref[...],
                preferred_element_type=jnp.float32)
    h = jnp.maximum(h + b1_ref[...], 0.0)

    # linear2: bf16 MXU inputs, f32 accumulation.
    y = jnp.dot(h.astype(jnp.bfloat16), w2_ref[...],
                preferred_element_type=jnp.float32)
    y = y + b2_ref[...]

    # F.normalize(y, p=2, dim=1) * sqrt(size2): clamp the squared norm at eps^2 so one EUP
    # rsqrt + a single per-row scalar multiply replaces sqrt + max + divide.
    sq = jnp.sum(y * y, axis=1, keepdims=True)
    inv = jax.lax.rsqrt(jnp.maximum(sq, 1e-24)) * scale
    o_ref[...] = (y * inv).astype(o_ref.dtype)


def _round_up(x, m):
    return ((x + m - 1) // m) * m


def _choose_tile_n(n, tile_n_max, sublane):
    # Small N: a single tile rounded up to the sublane multiple (ragged tail is masked).
    if n <= 256:
        return _round_up(max(n, 1), sublane)
    # Moderate/large N: big tiles for DMA efficiency, but never fewer than 2 grid steps so the
    # "parallel" row axis can be split across v7x's two TensorCores.
    return min(_round_up(tile_n_max, sublane), _round_up(pl.cdiv(n, 2), sublane))


def _vmem_limit_bytes(tile_n, in_f, s1p, s2, out_bytes):
    # Resident bf16 weights + f32 biases (x2: Pallas double-buffers even constant blocks),
    # double-buffered f32-x / out tiles, plus the f32 working set (h, y, scaled output).
    resident = 2 * ((in_f * s1p + s1p * s2) * 2 + (s1p + s2) * 4)
    streamed = 2 * tile_n * in_f * 4 + 2 * tile_n * s2 * out_bytes
    working = tile_n * (s1p + 2 * s2) * 4
    est = 2 * (resident + streamed + working) + (2 << 20)
    return int(min(max(est, 4 << 20), 32 << 20))


def channel_encoder(x, w1, b1, w2, b2, *, tile_n_max=1024, out_dtype=jnp.float32):
    """Channel_Encoder forward (channel_coding=True path).

    x: [N, in_features] f32.  w1: [in_features, size1], w2: [size1, size2] (transposed vs.
    torch.nn.Linear).  Returns [N, size2] in out_dtype (default f32).
    """
    n, in_f = x.shape
    size1 = w1.shape[1]
    size2 = w2.shape[1]

    out_bytes = jnp.dtype(out_dtype).itemsize
    sublane = 8 if out_bytes >= 4 else 16
    tile_n = _choose_tile_n(n, tile_n_max, sublane)
    grid = (pl.cdiv(n, tile_n),)

    # Zero-pad the hidden dim to a lane multiple so h is lane-dense (identical math).
    s1p = _round_up(size1, _LANE)
    w1_bf = jnp.pad(w1, ((0, 0), (0, s1p - size1))).astype(jnp.bfloat16)
    w2_bf = jnp.pad(w2, ((0, s1p - size1), (0, 0))).astype(jnp.bfloat16)
    b1_2d = jnp.pad(b1, (0, s1p - size1)).reshape(1, s1p).astype(jnp.float32)
    b2_2d = b2.reshape(1, size2).astype(jnp.float32)

    kernel = functools.partial(channel_encoder_kernel, scale=float(math.sqrt(size2)))

    cost = pl.CostEstimate(
        flops=2 * n * (in_f * s1p + s1p * size2) + 8 * n * size2,
        transcendentals=n,
        bytes_accessed=n * in_f * 4 + n * size2 * out_bytes
        + (in_f * s1p + s1p * size2) * 2 + (s1p + size2) * 4,
    )

    return pl.pallas_call(
        kernel,
        out_shape=jax.ShapeDtypeStruct((n, size2), out_dtype),
        grid=grid,
        in_specs=[
            pl.BlockSpec((tile_n, in_f), lambda i: (i, 0)),     # streamed f32 x tile
            pl.BlockSpec((in_f, s1p), lambda i: (0, 0)),        # resident bf16 w1
            pl.BlockSpec((1, s1p), lambda i: (0, 0)),           # resident f32 b1
            pl.BlockSpec((s1p, size2), lambda i: (0, 0)),       # resident bf16 w2
            pl.BlockSpec((1, size2), lambda i: (0, 0)),         # resident f32 b2
        ],
        out_specs=pl.BlockSpec((tile_n, size2), lambda i: (i, 0)),
        compiler_params=pltpu.CompilerParams(
            dimension_semantics=("parallel",),
            vmem_limit_bytes=_vmem_limit_bytes(tile_n, in_f, s1p, size2, out_bytes),
        ),
        cost_estimate=cost,
    )(x, w1_bf, b1_2d, w2_bf, b2_2d)


def _init_linear(key, in_dim, out_dim):
    """Deterministic PyTorch-Linear-style init: U(-1/sqrt(in), 1/sqrt(in))."""
    kw, kb = jax.random.split(key)
    bound = 1.0 / math.sqrt(in_dim)
    # stored as [in_dim, out_dim] (transpose of torch's [out, in])
    w = jax.random.uniform(kw, (in_dim, out_dim), jnp.float32, -bound, bound)
    b = jax.random.uniform(kb, (out_dim,), jnp.float32, -bound, bound)
    return w, b


def _reference_f32(x, w1, b1, w2, b2):
    """Full-f32 reference matching the PyTorch module semantics."""
    h = jnp.maximum(x @ w1 + b1, 0.0)
    y = h @ w2 + b2
    norm = jnp.sqrt(jnp.sum(y * y, axis=1, keepdims=True))
    return y / jnp.maximum(norm, 1e-12) * jnp.sqrt(jnp.float32(y.shape[1]))


if __name__ == "__main__":
    # Channel_Encoder(in_features=32, size1=64, size2=128), x: [N, in_features]
    in_features, size1, size2 = 32, 64, 128

    key = jax.random.PRNGKey(0)
    kx1, kx2, k1, k2 = jax.random.split(key, 4)
    w1, b1 = _init_linear(k1, in_features, size1)
    w2, b2 = _init_linear(k2, size1, size2)

    # Case 1: small batch (single grid step, exact tile).
    N = 8
    x = jax.random.normal(kx1, (N, in_features), jnp.float32)
    out = jax.block_until_ready(channel_encoder(x, w1, b1, w2, b2))
    ref = _reference_f32(x, w1, b1, w2, b2)
    assert out.shape == (N, size2)
    # bf16 matmul inputs with f32 accumulation -> loose tolerance vs. the f32 reference.
    assert jnp.allclose(out, ref, atol=5e-2, rtol=5e-2), float(jnp.max(jnp.abs(out - ref)))
    # Output rows must still have exact L2 norm sqrt(size2) (normalization done in f32).
    row_norms = jnp.sqrt(jnp.sum(out * out, axis=1))
    assert jnp.allclose(row_norms, jnp.full((N,), math.sqrt(size2)), atol=1e-3, rtol=1e-3)

    # Case 2: row count exercising >= 2 grid steps and a ragged last block (no pad/slice copies).
    N2 = 300
    x2 = jax.random.normal(kx2, (N2, in_features), jnp.float32)
    out2 = jax.block_until_ready(channel_encoder(x2, w1, b1, w2, b2))
    ref2 = _reference_f32(x2, w1, b1, w2, b2)
    assert out2.shape == (N2, size2)
    assert jnp.allclose(out2, ref2, atol=5e-2, rtol=5e-2), float(jnp.max(jnp.abs(out2 - ref2)))
    row_norms2 = jnp.sqrt(jnp.sum(out2 * out2, axis=1))
    assert jnp.allclose(row_norms2, jnp.full((N2,), math.sqrt(size2)), atol=1e-3, rtol=1e-3)

    print("KERNEL_OK")
</pallas_src>

<mosaic_0001>
module attributes {stable_mosaic.version = 11 : i64} {
  func.func @channel_encoder_kernel(%arg0: i32, %arg1: memref<8x32xf32, #tpu.memory_space<vmem>>, %arg2: memref<32x128xbf16, #tpu.memory_space<vmem>>, %arg3: memref<1x128xf32, #tpu.memory_space<vmem>>, %arg4: memref<128x128xbf16, #tpu.memory_space<vmem>>, %arg5: memref<1x128xf32, #tpu.memory_space<vmem>>, %arg6: memref<8x128xf32, #tpu.memory_space<vmem>>) attributes {dimension_semantics = [#tpu.dimension_semantics<parallel>], iteration_bounds = array<i64: 1>, scalar_prefetch = 0 : i64, scratch_operands = 0 : i64, tpu.core_type = #tpu.core_type<tc>, window_params = [{transform_indices = @transform_0, window_bounds = array<i64: 8, 32>}, {pipeline_mode = #tpu.pipeline_mode<synchronous>, transform_indices = @transform_1, window_bounds = array<i64: 32, 128>}, {pipeline_mode = #tpu.pipeline_mode<synchronous>, transform_indices = @transform_2, window_bounds = array<i64: 1, 128>}, {pipeline_mode = #tpu.pipeline_mode<synchronous>, transform_indices = @transform_3, window_bounds = array<i64: 128, 128>}, {pipeline_mode = #tpu.pipeline_mode<synchronous>, transform_indices = @transform_4, window_bounds = array<i64: 1, 128>}, {transform_indices = @transform_5, window_bounds = array<i64: 8, 128>}]} {
    %c0 = arith.constant 0 : index
    %c0_0 = arith.constant 0 : index
    %0 = vector.load %arg1[%c0, %c0_0] : memref<8x32xf32, #tpu.memory_space<vmem>>, vector<8x32xf32>
    %1 = arith.truncf %0 : vector<8x32xf32> to vector<8x32xbf16>
    %c0_1 = arith.constant 0 : index
    %c0_2 = arith.constant 0 : index
    %2 = vector.load %arg2[%c0_1, %c0_2] : memref<32x128xbf16, #tpu.memory_space<vmem>>, vector<32x128xbf16>
    %cst = arith.constant dense<0.000000e+00> : vector<8x128xf32>
    %3 = tpu.matmul %1, %2, %cst {dimension_numbers = #tpu.dot_dimension_numbers<[1], [0], [0], [1], [0, 0, 1, 1], [], []>} : vector<8x32xbf16>, vector<32x128xbf16>, vector<8x128xf32> -> vector<8x128xf32>
    %c0_3 = arith.constant 0 : index
    %c0_4 = arith.constant 0 : index
    %4 = vector.load %arg3[%c0_3, %c0_4] : memref<1x128xf32, #tpu.memory_space<vmem>>, vector<1x128xf32>
    %5 = vector.broadcast %4 : vector<1x128xf32> to vector<8x128xf32>
    %6 = arith.addf %3, %5 : vector<8x128xf32>
    %cst_5 = arith.constant 0.000000e+00 : f32
    %7 = vector.broadcast %cst_5 : f32 to vector<8x128xf32>
    %8 = arith.maximumf %6, %7 : vector<8x128xf32>
    %9 = arith.truncf %8 : vector<8x128xf32> to vector<8x128xbf16>
    %c0_6 = arith.constant 0 : index
    %c0_7 = arith.constant 0 : index
    %10 = vector.load %arg4[%c0_6, %c0_7] : memref<128x128xbf16, #tpu.memory_space<vmem>>, vector<128x128xbf16>
    %cst_8 = arith.constant dense<0.000000e+00> : vector<8x128xf32>
    %11 = tpu.matmul %9, %10, %cst_8 {dimension_numbers = #tpu.dot_dimension_numbers<[1], [0], [0], [1], [0, 0, 1, 1], [], []>} : vector<8x128xbf16>, vector<128x128xbf16>, vector<8x128xf32> -> vector<8x128xf32>
    %c0_9 = arith.constant 0 : index
    %c0_10 = arith.constant 0 : index
    %12 = vector.load %arg5[%c0_9, %c0_10] : memref<1x128xf32, #tpu.memory_space<vmem>>, vector<1x128xf32>
    %13 = vector.broadcast %12 : vector<1x128xf32> to vector<8x128xf32>
    %14 = arith.addf %11, %13 : vector<8x128xf32>
    %15 = arith.mulf %14, %14 : vector<8x128xf32>
    %cst_11 = arith.constant dense<0.000000e+00> : vector<8xf32>
    %16 = vector.multi_reduction <add>, %15, %cst_11 [1] : vector<8x128xf32> to vector<8xf32>
    %17 = vector.shape_cast %16 : vector<8xf32> to vector<8x1xf32>
    %cst_12 = arith.constant 1.000000e-24 : f32
    %18 = vector.broadcast %cst_12 : f32 to vector<8x1xf32>
    %19 = arith.maximumf %17, %18 : vector<8x1xf32>
    %20 = math.rsqrt %19 : vector<8x1xf32>
    %cst_13 = arith.constant 11.3137083 : f32
    %21 = vector.broadcast %cst_13 : f32 to vector<8x1xf32>
    %22 = arith.mulf %20, %21 : vector<8x1xf32>
    %23 = vector.broadcast %22 : vector<8x1xf32> to vector<8x128xf32>
    %24 = arith.mulf %14, %23 : vector<8x128xf32>
    %c0_14 = arith.constant 0 : index
    %c0_15 = arith.constant 0 : index
    %25 = vector.load %arg6[%c0_14, %c0_15] : memref<8x128xf32, #tpu.memory_space<vmem>>, vector<8x128xf32>
    tpu.vector_store %arg6[%c0_14, %c0_15], %24 {strides = array<i32>} : memref<8x128xf32, #tpu.memory_space<vmem>>, vector<8x128xf32>,
    return
  }
  func.func @transform_0(%arg0: i32) -> (i32, i32) {
    %c0_i32 = arith.constant 0 : i32
    %c0_i32_0 = arith.constant 0 : i32
    return %arg0, %c0_i32 : i32, i32
  }
  func.func @transform_1(%arg0: i32) -> (i32, i32) {
    %c0_i32 = arith.constant 0 : i32
    %c0_i32_0 = arith.constant 0 : i32
    %c0_i32_1 = arith.constant 0 : i32
    return %c0_i32, %c0_i32_0 : i32, i32
  }
  func.func @transform_2(%arg0: i32) -> (i32, i32) {
    %c0_i32 = arith.constant 0 : i32
    %c0_i32_0 = arith.constant 0 : i32
    %c0_i32_1 = arith.constant 0 : i32
    return %c0_i32, %c0_i32_0 : i32, i32
  }
  func.func @transform_3(%arg0: i32) -> (i32, i32) {
    %c0_i32 = arith.constant 0 : i32
    %c0_i32_0 = arith.constant 0 : i32
    %c0_i32_1 = arith.constant 0 : i32
    return %c0_i32, %c0_i32_0 : i32, i32
  }
  func.func @transform_4(%arg0: i32) -> (i32, i32) {
    %c0_i32 = arith.constant 0 : i32
    %c0_i32_0 = arith.constant 0 : i32
    %c0_i32_1 = arith.constant 0 : i32
    return %c0_i32, %c0_i32_0 : i32, i32
  }
  func.func @transform_5(%arg0: i32) -> (i32, i32) {
    %c0_i32 = arith.constant 0 : i32
    %c0_i32_0 = arith.constant 0 : i32
    return %arg0, %c0_i32 : i32, i32
  }
}

</mosaic_0001>

<bundles_post_ra>
// kernel: tpu_custom_call.1
= control target key start
LH: loop header
LB: loop body
LE: loop exit
PB: predicated region body
PF: predicated region fallthrough
CT: control target
= control target key end

     0   :  { %10 = vsyncpa [#allocation3], 0  ;;  %s441_s0 = inlined_call_operand.hbm [shape: f32[8,32], index: 0, kind: input, shape index: {}]   ;;  %s442_s1 = inlined_call_operand.hbm [shape: bf16[32,128], index: 1, kind: input, shape index: {}]   ;;  %s443_s2 = inlined_call_operand.vmem [shape: f32[1,128], index: 2, kind: input, shape index: {}]   ;;  %s444_s3 = inlined_call_operand.hbm [shape: bf16[128,128], index: 3, kind: input, shape index: {}]   ;;  %s445_s4 = inlined_call_operand.vmem [shape: f32[1,128], index: 4, kind: input, shape index: {}]   ;;  %s446_s5 = inlined_call_operand.hbm [shape: f32[8,128], index: 5, kind: output, shape index: {}]  }
   0x1   :  { %11 = vsyncpa [#allocation6], 0  ;;  %s28_s20 = sshll.u32 %s442_s1, 4  ;;  %s29_s20 = int_to_ptr.hbm [resolvable:$true] %s28_s20 }
   0x2   :  { %12 = vsyncpa [#allocation4], 0  ;;  %s387_s21 = smov [#allocation5]   ;;  %s18_s25 = sshll.u32 %s441_s0, 4  ;;  %s19_s25 = int_to_ptr.hbm [resolvable:$true] %s18_s25 }
   0x3   :  { %s30_s22 = sshll.u32 %s387_s21, 4  ;;  %s388_s26 = smov 64   ;;  %s31_s22 = int_to_ptr.vmem [resolvable:$true] %s30_s22 }
   0x4   :  { %s389_s27 = smov 4   ;;  %s390_s28 = smov [#allocation2]  }
   0x5   :  { %36 = dma.hbm_to_vmem [thread:$0]  %s29_s20, 256, %s31_s22, [#allocation6], %s388_s26, %s388_s26, %s389_s27  }
   0x6   :  { %s20_s29 = sshll.u32 %s390_s28, 4  ;;  %s43_s7 = sshll.u32 %s444_s3, 4  ;;  %s21_s29 = int_to_ptr.vmem [resolvable:$true] %s20_s29  ;;  %s44_s7 = int_to_ptr.hbm [resolvable:$true] %s43_s7 }
   0x7   :  { %23 = dma.hbm_to_vmem [thread:$0]  %s19_s25, 128, %s21_s29, [#allocation3]  }
   0x8   :  { %s391_s1 = smov [#allocation7]  }
   0x9   :  { %s45_s8 = sshll.u32 %s391_s1, 4  ;;  %s46_s8 = int_to_ptr.vmem [resolvable:$true] %s45_s8 }
   0xa   :  { %51 = dma.hbm_to_vmem [thread:$0]  %s44_s7, 1024, %s46_s8, [#allocation6], %s388_s26, %s388_s26, %s389_s27  }
   0xb   :  { %381 = dma.done.wait [#allocation3], 128  }
   0xc   :  { %382 = vsyncadd [#allocation3], 4294967168 }
   0xd   :  { %383 = dma.done.wait [#allocation6], 1280  }
   0xe   :  { %384 = vsyncadd [#allocation6], 4294966016  ;;  %v266_v0 = vld [vmem:[#allocation5 + $0x8] sm:$0xff]  ;;  %v265_v2 = vld [vmem:[#allocation5] sm:$0xff]  ;;  %vm89_vm0 = vcmask 261120   ;;  %s213_s13 = sshll.u32 %s446_s5, 4  ;;  %s214_s13 = int_to_ptr.hbm [resolvable:$true] %s213_s13 }
   0xf   :  { %v274_v1 = vld [vmem:[#allocation7 + $0x38] sm:$0xff]  ;;  %99 = vmatpush.bf16.msra.mxu0 %v266_v0  ;;  %v67_v3 = vld [vmem:[#allocation2] sm:$0xff]  ;;  %v273_v4 = vld [vmem:[#allocation7 + $0x30] sm:$0xff] }
  0x10   :  { %176 = vmatpush.bf16.msra.mxu1 %v274_v1  ;;  %v68_v5 = vpack.c.bf16 %v67_v3, %v67_v3  ;;  %v272_v6 = vld [vmem:[#allocation7 + $0x28] sm:$0xff]  ;;  %v271_v7 = vld [vmem:[#allocation7 + $0x20] sm:$0xff]  ;;  %v270_v8 = vld [vmem:[#allocation7 + $0x18] sm:$0xff] }
  0x11   :  { %v269_v9 = vld [vmem:[#allocation7 + $0x10] sm:$0xff]  ;;  %v268_v10 = vld [vmem:[#allocation7 + $0x8] sm:$0xff]  ;;  %v267_v11 = vld [vmem:[#allocation7] sm:$0xff] }
  0x12   :  { %v281_v12 = vld [vmem:[%s443_s2] ss:$0 sm:$0xff]  ;;  %s392_s2 = smov [#allocation8]  }
  0x13   :  { %100 = vmatpush.bf16.msra.mxu0 %v265_v2  ;;  %v282_v18 = vld [vmem:[%s445_s4] ss:$0 sm:$0xff]  ;;  %s211_s4 = sshll.u32 %s392_s2, 4  ;;  %s212_s4 = int_to_ptr.vmem [resolvable:$true] %s211_s4 }
  0x14   :  { %177 = vmatpush.bf16.msra.mxu1 %v273_v4 }
  0x16   :  { %232 = vmatmul.msk.bf16.vlgmr.msra.gmra.mxu0 %vm89_vm0, %v68_v5 }
  0x18   :  { %178 = vmatpush.bf16.msra.mxu1 %v272_v6 }
  0x1c   :  { %179 = vmatpush.bf16.msra.mxu1 %v271_v7 }
  0x20   :  { %180 = vmatpush.bf16.msra.mxu1 %v270_v8 }
  0x24   :  { %181 = vmatpush.bf16.msra.mxu1 %v269_v9 }
  0x28   :  { %182 = vmatpush.bf16.msra.mxu1 %v268_v10 }
  0x2c   :  { %183 = vmatpush.bf16.msra.mxu1 %v267_v11 }
  0x93   :  { %v102_v13 = vpop.f32.mrf.mxu0 }
  0x94   :  { %v103_v14 = vadd.f32 %v281_v12, %v102_v13 }
  0x96   :  { %v106_v15 = vmax.f32 %v103_v14, 0.0 }
  0x98   :  { %v107_v16 = vpack.c.bf16 %v106_v15, %v106_v15 }
  0x9a   :  { %184 = vmatmul.bf16.vlgmr.msra.gmra.mxu1 %v107_v16 }
  0x9b   :  { %v104_v17 = vpop.f32.mrf.mxu0 }
 0x117   :  { %v185_v19 = vpop.f32.mrf.mxu1 }
 0x118   :  { %v186_v20 = vadd.f32 %v282_v18, %v185_v19 }
 0x11a   :  { %v189_v21 = vmul.f32 %v186_v20, %v186_v20 }
 0x11c   :  { %190 = vadd.xlane.f32.xlu0 %v189_v21 }
 0x11f   :  { %v187_v22 = vpop.f32.mrf.mxu1 }
 0x18f   :  { %v191_v23 = vpop.xlane.xlu0 %190 }
 0x190   :  { %v192_v24 = vmax.f32 %v191_v23, 1e-24 }
 0x192   :  { %283 = vrsqrt.f32 %v192_v24  ;;  %vm199_vm2 = vweird.f32 %v192_v24 }
 0x198   :  { %v284_v25 = vpop.eup %283 }
 0x199   :  { %v194_v26 = vmul.f32 %v284_v25, %v192_v24  ;;  %vm200_vm1 = vweird.f32 %v284_v25 }
 0x19a   :  { %vm201_vm3 = vmor %vm199_vm2, %vm200_vm1 }
 0x19b   :  { %v195_v27 = vmul.f32 %v284_v25, %v194_v26 }
 0x19d   :  { %v196_v28 = vmul.f32 0.5, %v195_v27 }
 0x19f   :  { %v197_v29 = vsub.f32 1.5, %v196_v28 }
 0x1a1   :  { %v198_v30 = vmul.f32 %v284_v25, %v197_v29 }
 0x1a3   :  { %v202_v31 = vsel %vm201_vm3, %v284_v25, %v198_v30 }
 0x1a4   :  { %v203_v32 = vmul.f32 11.313708, %v202_v31 }
 0x1a6   :  { %v204_v33 = vmul.f32 %v203_v32, %v186_v20 }
 0x1a8   :  { %205 = vst [vmem:[#allocation8] sm:$0xff] %v204_v33 }
 0x1a9   :  { %216 = dma.vmem_to_hbm [thread:$0]  %s212_s4, 128, %s214_s13, [#allocation4]  }
 0x1aa   :  { %385 = dma.done.wait [#allocation4], 128  }
 0x1ab   :  { %386 = vsyncadd [#allocation4], 4294967168 }
 0x1ac   :  { %221 = vsyncpa [#allocation3], 1 }
 0x1ad   :  { %222 = vsyncpa [#allocation6], 1 }
 0x1ae   :  { %223 = vsyncpa [#allocation4], 1 }

</bundles_post_ra>
